<compile_context>
chip_gen: v5e
topology: v5e:2x2
jax: 0.10.0
libtpu: 0.0.40
codegen_flags: <defaults>
</compile_context>

<pallas_src>
import functools
import math

import jax
import jax.numpy as jnp
from jax.experimental import pallas as pl
from jax.experimental.pallas import tpu as pltpu


# ---------------------------------------------------------------------------
# host-side helpers
# ---------------------------------------------------------------------------
def _round_up(x, m):
    return ((x + m - 1) // m) * m


@functools.lru_cache(maxsize=1)
def _vmem_budget_bytes():
    """Per-TensorCore VMEM budget (leave headroom for compiler temporaries)."""
    cap = 64 << 20  # conservative fallback (v7x-sized VMEM)
    try:
        info = pltpu.get_tpu_info()
        cap = int(getattr(info, "vmem_capacity_bytes", cap) or cap)
    except Exception:
        pass
    # ~48 MiB on v7x (64 MiB physical), ~96 MiB on v5e/v6e (128 MiB physical)
    return int(cap * 3 // 4)


def _select_config(M, Cp, Hp, out_bytes, budget):
    """Pick (tm, th, weights_resident) under the VMEM budget.

    Prefers the weight-resident path (th == Hp): weights are DMA'd from HBM
    exactly once instead of once per M-tile and the accumulator disappears.
    """
    cdt = 2  # bf16 compute operands
    tm_cands = (1024, 512, 256, 128)
    m_pad128 = _round_up(M, 128)

    def tm_ok(tm):
        if tm > m_pad128:
            return False  # don't pad M beyond one 128-aligned tile of work
        # keep >=2 M-tiles when there is enough work (v7x has 2 TensorCores)
        if M > 256 and pl.cdiv(M, tm) < 2:
            return False
        return True

    # --- path A: full weights resident in VMEM, single hidden step ----------
    for tm in tm_cands:
        if not tm_ok(tm):
            continue
        fp = (2 * tm * Cp * cdt            # x tile (double buffered)
              + 2 * Cp * Hp * cdt          # Wfc   (count 2 buffers, conservative)
              + 2 * Hp * Cp * cdt          # Wproj (count 2 buffers, conservative)
              + 2 * tm * Cp * out_bytes    # output tile (double buffered)
              + tm * Hp * (4 + cdt))       # f32 GELU intermediate + bf16 cast
        if fp <= budget:
            return tm, Hp, True

    # --- path B: tile the hidden (4C) dim, f32 accumulator resident ---------
    for tm in tm_cands:
        if not tm_ok(tm):
            continue
        for th in (2048, 1024, 512, 256, 128):
            if th > Hp or Hp % th:
                continue
            fp = (2 * tm * Cp * cdt
                  + 2 * Cp * th * cdt
                  + 2 * th * Cp * cdt
                  + 2 * tm * Cp * out_bytes
                  + tm * Cp * 4              # f32 accumulator scratch
                  + tm * th * (4 + cdt))     # f32 GELU intermediate + bf16 cast
            if fp <= budget:
                return tm, th, False

    # last resort: smallest legal tiles
    return 128, 128, False


# ---------------------------------------------------------------------------
# in-kernel math (pure jnp / pl, traced inside the Pallas bodies)
# ---------------------------------------------------------------------------
def _erf(x):
    # Abramowitz & Stegun 7.1.26 polynomial (max abs err ~1.5e-7): matches
    # torch.nn.functional.gelu's exact (erf-based) GELU to ~f32 precision.
    a1, a2, a3, a4, a5 = 0.254829592, -0.284496736, 1.421413741, -1.453152027, 1.061405429
    p = 0.3275911
    s = jnp.where(x >= 0.0, 1.0, -1.0)
    ax = jnp.abs(x)
    # approx reciprocal goes to the EUP (separate VLIW slot -> effectively free)
    t = pl.reciprocal(1.0 + p * ax, approx=True)
    poly = ((((a5 * t + a4) * t + a3) * t + a2) * t + a1) * t
    y = 1.0 - poly * jnp.exp(-ax * ax)
    return s * y


def _gelu_exact(x):
    return 0.5 * x * (1.0 + _erf(x * (1.0 / math.sqrt(2.0))))


# ---------------------------------------------------------------------------
# Pallas kernels
# ---------------------------------------------------------------------------
def mlp_kernel_resident(x_ref, wfc_ref, wproj_ref, o_ref):
    """Grid point i: full weights resident in VMEM, single hidden step."""
    h = jnp.dot(x_ref[...], wfc_ref[...], preferred_element_type=jnp.float32)
    h = _gelu_exact(h)  # f32 elementwise (safe on v5e)
    o_ref[...] = jnp.dot(
        h.astype(wproj_ref.dtype), wproj_ref[...], preferred_element_type=jnp.float32
    ).astype(o_ref.dtype)


def mlp_kernel_tiled(x_ref, wfc_ref, wproj_ref, o_ref, acc_ref):
    """Grid point (i, k): M-tile i, hidden(4C)-tile k; f32 accumulator resident."""
    k = pl.program_id(1)

    @pl.when(k == 0)
    def _():
        acc_ref[...] = jnp.zeros_like(acc_ref)

    h = jnp.dot(x_ref[...], wfc_ref[...], preferred_element_type=jnp.float32)
    h = _gelu_exact(h)
    acc_ref[...] += jnp.dot(
        h.astype(wproj_ref.dtype), wproj_ref[...], preferred_element_type=jnp.float32
    )

    @pl.when(k == pl.num_programs(1) - 1)
    def _():
        o_ref[...] = acc_ref[...].astype(o_ref.dtype)


# ---------------------------------------------------------------------------
# wrappers
# ---------------------------------------------------------------------------
def prepare_mlp_weights(w_fc, w_proj, compute_dtype=jnp.bfloat16):
    """Transpose + cast + lane-pad the nn.Linear weights ONCE (hoisted out of
    the per-call forward).

      w_fc:   (4C, C)  PyTorch layout  ->  (Cp, Hp) bf16, zero-padded
      w_proj: (C, 4C)                   ->  (Hp, Cp) bf16, zero-padded
    """
    H, C = w_fc.shape
    assert w_proj.shape == (C, H)
    Cp = _round_up(C, 128)
    Hp = _round_up(H, 128)
    wfc_t = jnp.zeros((Cp, Hp), compute_dtype).at[:C, :H].set(
        jnp.asarray(w_fc, compute_dtype).T
    )
    wproj_t = jnp.zeros((Hp, Cp), compute_dtype).at[:H, :C].set(
        jnp.asarray(w_proj, compute_dtype).T
    )
    return wfc_t, wproj_t


@jax.jit
def mlp_forward_prepared(x, wfc_t, wproj_t):
    """y = gelu(x @ Wfc^T) @ Wproj^T with pre-prepared (transposed/padded bf16)
    weights.  Output dtype / last dim match the input x."""
    orig_shape = x.shape
    C = orig_shape[-1]
    Cp, Hp = wfc_t.shape
    assert wproj_t.shape == (Hp, Cp) and C <= Cp

    compute_dtype = wfc_t.dtype
    out_dtype = x.dtype
    out_bytes = jnp.dtype(out_dtype).itemsize

    xm = x.reshape(-1, C).astype(compute_dtype)
    M = xm.shape[0]

    budget = _vmem_budget_bytes()
    tm, th, resident = _select_config(M, Cp, Hp, out_bytes, budget)
    Mp = _round_up(max(M, tm), tm)

    # zero-pad rows/cols to the tiled shape (exact: padded columns are all-zero
    # and gelu(0) == 0, so padded lanes contribute nothing).
    xm = jnp.pad(xm, ((0, Mp - M), (0, Cp - C)))

    if resident:
        out = pl.pallas_call(
            mlp_kernel_resident,
            out_shape=jax.ShapeDtypeStruct((Mp, Cp), out_dtype),
            grid=(Mp // tm,),
            in_specs=[
                pl.BlockSpec((tm, Cp), lambda i: (i, 0)),   # x rows
                pl.BlockSpec((Cp, Hp), lambda i: (0, 0)),   # Wfc  (resident)
                pl.BlockSpec((Hp, Cp), lambda i: (0, 0)),   # Wproj (resident)
            ],
            out_specs=pl.BlockSpec((tm, Cp), lambda i: (i, 0)),
            compiler_params=pltpu.CompilerParams(
                dimension_semantics=("parallel",),
                vmem_limit_bytes=budget,
            ),
        )(xm, wfc_t, wproj_t)
    else:
        out = pl.pallas_call(
            mlp_kernel_tiled,
            out_shape=jax.ShapeDtypeStruct((Mp, Cp), out_dtype),
            grid=(Mp // tm, Hp // th),                      # reduction axis last
            in_specs=[
                pl.BlockSpec((tm, Cp), lambda i, k: (i, 0)),  # x rows
                pl.BlockSpec((Cp, th), lambda i, k: (0, k)),  # Wfc hidden tile
                pl.BlockSpec((th, Cp), lambda i, k: (k, 0)),  # Wproj hidden tile
            ],
            out_specs=pl.BlockSpec((tm, Cp), lambda i, k: (i, 0)),
            scratch_shapes=[pltpu.VMEM((tm, Cp), jnp.float32)],
            compiler_params=pltpu.CompilerParams(
                dimension_semantics=("parallel", "arbitrary"),
                vmem_limit_bytes=budget,
            ),
        )(xm, wfc_t, wproj_t)

    out = out[:M, :C]
    return out.reshape(orig_shape)


def mlp_forward(x, w_fc, w_proj, *, compute_dtype=jnp.bfloat16):
    """Convenience one-shot wrapper (prefer prepare_mlp_weights + the prepared
    forward in real use, so the transpose/cast isn't paid every call)."""
    wfc_t, wproj_t = prepare_mlp_weights(w_fc, w_proj, compute_dtype)
    return mlp_forward_prepared(x, wfc_t, wproj_t)


# ---------------------------------------------------------------------------
# deterministic demo
# ---------------------------------------------------------------------------
if __name__ == "__main__":
    # small config consistent with the module: n_embd=32, seq=8, batch=2
    B, T, C = 2, 8, 32
    H = 4 * C

    key = jax.random.PRNGKey(0)
    kx, kfc, kproj = jax.random.split(key, 3)
    x = jax.random.normal(kx, (B, T, C), jnp.float32)
    w_fc = jax.random.normal(kfc, (H, C), jnp.float32) * (1.0 / math.sqrt(C))
    w_proj = jax.random.normal(kproj, (C, H), jnp.float32) * (1.0 / math.sqrt(H))

    # weights prepared once (hoisted transpose / cast / pad)
    wfc_t, wproj_t = prepare_mlp_weights(w_fc, w_proj)

    y = mlp_forward_prepared(x, wfc_t, wproj_t)
    y = jax.block_until_ready(y)
    assert y.shape == (B, T, C)

    # plain-JAX reference (exact erf GELU, f32); loose tolerance because the
    # kernel runs MXU operands in bf16.
    h_ref = x.reshape(-1, C) @ w_fc.T
    h_ref = jax.nn.gelu(h_ref, approximate=False)
    y_ref = (h_ref @ w_proj.T).reshape(B, T, C)
    max_err = float(jnp.max(jnp.abs(y - y_ref)))
    assert jnp.allclose(y, y_ref, atol=1e-1, rtol=1e-1), max_err

    print("KERNEL_OK")
</pallas_src>

<mosaic_0001>
module attributes {stable_mosaic.version = 11 : i64} {
  func.func @mlp_kernel_resident(%arg0: i32, %arg1: memref<128x128xbf16, #tpu.memory_space<vmem>>, %arg2: memref<128x128xbf16, #tpu.memory_space<vmem>>, %arg3: memref<128x128xbf16, #tpu.memory_space<vmem>>, %arg4: memref<128x128xf32, #tpu.memory_space<vmem>>) attributes {dimension_semantics = [#tpu.dimension_semantics<parallel>], iteration_bounds = array<i64: 1>, scalar_prefetch = 0 : i64, scratch_operands = 0 : i64, tpu.core_type = #tpu.core_type<tc>, window_params = [{transform_indices = @transform_0, window_bounds = array<i64: 128, 128>}, {pipeline_mode = #tpu.pipeline_mode<synchronous>, transform_indices = @transform_1, window_bounds = array<i64: 128, 128>}, {pipeline_mode = #tpu.pipeline_mode<synchronous>, transform_indices = @transform_2, window_bounds = array<i64: 128, 128>}, {transform_indices = @transform_3, window_bounds = array<i64: 128, 128>}]} {
    %c0 = arith.constant 0 : index
    %c0_0 = arith.constant 0 : index
    %0 = vector.load %arg1[%c0, %c0_0] : memref<128x128xbf16, #tpu.memory_space<vmem>>, vector<128x128xbf16>
    %c0_1 = arith.constant 0 : index
    %c0_2 = arith.constant 0 : index
    %1 = vector.load %arg2[%c0_1, %c0_2] : memref<128x128xbf16, #tpu.memory_space<vmem>>, vector<128x128xbf16>
    %cst = arith.constant dense<0.000000e+00> : vector<128x128xf32>
    %2 = tpu.matmul %0, %1, %cst {dimension_numbers = #tpu.dot_dimension_numbers<[1], [0], [0], [1], [0, 0, 1, 1], [], []>} : vector<128x128xbf16>, vector<128x128xbf16>, vector<128x128xf32> -> vector<128x128xf32>
    %cst_3 = arith.constant 5.000000e-01 : f32
    %3 = vector.broadcast %cst_3 : f32 to vector<128x128xf32>
    %4 = arith.mulf %3, %2 : vector<128x128xf32>
    %cst_4 = arith.constant 0.707106769 : f32
    %5 = vector.broadcast %cst_4 : f32 to vector<128x128xf32>
    %6 = arith.mulf %2, %5 : vector<128x128xf32>
    %cst_5 = arith.constant 0.000000e+00 : f32
    %7 = vector.broadcast %cst_5 : f32 to vector<128x128xf32>
    %8 = arith.cmpf oge, %6, %7 : vector<128x128xf32>
    %cst_6 = arith.constant 1.000000e+00 : f32
    %cst_7 = arith.constant -1.000000e+00 : f32
    %9 = vector.broadcast %cst_6 : f32 to vector<128x128xf32>
    %10 = vector.broadcast %cst_7 : f32 to vector<128x128xf32>
    %11 = arith.select %8, %9, %10 : vector<128x128xi1>, vector<128x128xf32>
    %12 = math.absf %6 : vector<128x128xf32>
    %cst_8 = arith.constant 0.327591091 : f32
    %13 = vector.broadcast %cst_8 : f32 to vector<128x128xf32>
    %14 = arith.mulf %13, %12 : vector<128x128xf32>
    %cst_9 = arith.constant 1.000000e+00 : f32
    %15 = vector.broadcast %cst_9 : f32 to vector<128x128xf32>
    %16 = arith.addf %15, %14 : vector<128x128xf32>
    %17 = tpu.reciprocal %16 {approx = true} : vector<128x128xf32> -> vector<128x128xf32>
    %cst_10 = arith.constant 1.06140542 : f32
    %18 = vector.broadcast %cst_10 : f32 to vector<128x128xf32>
    %19 = arith.mulf %18, %17 : vector<128x128xf32>
    %cst_11 = arith.constant -1.45315206 : f32
    %20 = vector.broadcast %cst_11 : f32 to vector<128x128xf32>
    %21 = arith.addf %19, %20 : vector<128x128xf32>
    %22 = arith.mulf %21, %17 : vector<128x128xf32>
    %cst_12 = arith.constant 1.42141378 : f32
    %23 = vector.broadcast %cst_12 : f32 to vector<128x128xf32>
    %24 = arith.addf %22, %23 : vector<128x128xf32>
    %25 = arith.mulf %24, %17 : vector<128x128xf32>
    %cst_13 = arith.constant -0.284496725 : f32
    %26 = vector.broadcast %cst_13 : f32 to vector<128x128xf32>
    %27 = arith.addf %25, %26 : vector<128x128xf32>
    %28 = arith.mulf %27, %17 : vector<128x128xf32>
    %cst_14 = arith.constant 0.254829586 : f32
    %29 = vector.broadcast %cst_14 : f32 to vector<128x128xf32>
    %30 = arith.addf %28, %29 : vector<128x128xf32>
    %31 = arith.mulf %30, %17 : vector<128x128xf32>
    %cst_15 = arith.constant 0.000000e+00 : f32
    %32 = vector.broadcast %cst_15 : f32 to vector<128x128xf32>
    %33 = arith.subf %32, %12 : vector<128x128xf32>
    %34 = arith.mulf %33, %12 : vector<128x128xf32>
    %35 = math.exp %34 : vector<128x128xf32>
    %36 = arith.mulf %31, %35 : vector<128x128xf32>
    %cst_16 = arith.constant 1.000000e+00 : f32
    %37 = vector.broadcast %cst_16 : f32 to vector<128x128xf32>
    %38 = arith.subf %37, %36 : vector<128x128xf32>
    %39 = arith.mulf %11, %38 : vector<128x128xf32>
    %cst_17 = arith.constant 1.000000e+00 : f32
    %40 = vector.broadcast %cst_17 : f32 to vector<128x128xf32>
    %41 = arith.addf %40, %39 : vector<128x128xf32>
    %42 = arith.mulf %4, %41 : vector<128x128xf32>
    %43 = arith.truncf %42 : vector<128x128xf32> to vector<128x128xbf16>
    %c0_18 = arith.constant 0 : index
    %c0_19 = arith.constant 0 : index
    %44 = vector.load %arg3[%c0_18, %c0_19] : memref<128x128xbf16, #tpu.memory_space<vmem>>, vector<128x128xbf16>
    %cst_20 = arith.constant dense<0.000000e+00> : vector<128x128xf32>
    %45 = tpu.matmul %43, %44, %cst_20 {dimension_numbers = #tpu.dot_dimension_numbers<[1], [0], [0], [1], [0, 0, 1, 1], [], []>} : vector<128x128xbf16>, vector<128x128xbf16>, vector<128x128xf32> -> vector<128x128xf32>
    %c0_21 = arith.constant 0 : index
    %c0_22 = arith.constant 0 : index
    %46 = vector.load %arg4[%c0_21, %c0_22] : memref<128x128xf32, #tpu.memory_space<vmem>>, vector<128x128xf32>
    tpu.vector_store %arg4[%c0_21, %c0_22], %45 {strides = array<i32>} : memref<128x128xf32, #tpu.memory_space<vmem>>, vector<128x128xf32>,
    return
  }
  func.func @transform_0(%arg0: i32) -> (i32, i32) {
    %c0_i32 = arith.constant 0 : i32
    %c0_i32_0 = arith.constant 0 : i32
    return %arg0, %c0_i32 : i32, i32
  }
  func.func @transform_1(%arg0: i32) -> (i32, i32) {
    %c0_i32 = arith.constant 0 : i32
    %c0_i32_0 = arith.constant 0 : i32
    %c0_i32_1 = arith.constant 0 : i32
    return %c0_i32, %c0_i32_0 : i32, i32
  }
  func.func @transform_2(%arg0: i32) -> (i32, i32) {
    %c0_i32 = arith.constant 0 : i32
    %c0_i32_0 = arith.constant 0 : i32
    %c0_i32_1 = arith.constant 0 : i32
    return %c0_i32, %c0_i32_0 : i32, i32
  }
  func.func @transform_3(%arg0: i32) -> (i32, i32) {
    %c0_i32 = arith.constant 0 : i32
    %c0_i32_0 = arith.constant 0 : i32
    return %arg0, %c0_i32 : i32, i32
  }
}

</mosaic_0001>

<bundles_post_ra>
// kernel: mlp_forward_prepared.1
= control target key start
LH: loop header
LB: loop body
LE: loop exit
PB: predicated region body
PF: predicated region fallthrough
CT: control target
= control target key end

     0   :  { %8 = vsyncpa [#allocation3], 0  ;;  %s995_s15 = smov [#allocation2]   ;;  %s996_s17 = smov 64   ;;  %s1518_s0 = inlined_call_operand.vmem [shape: bf16[128,128], index: 0, kind: input, shape index: {}]   ;;  %s1519_s1 = inlined_call_operand.vmem [shape: bf16[128,128], index: 1, kind: input, shape index: {}]   ;;  %s1520_s2 = inlined_call_operand.hbm [shape: bf16[128,128], index: 2, kind: input, shape index: {}]   ;;  %s1521_s3 = inlined_call_operand.vmem [shape: f32[128,128], index: 3, kind: output, shape index: {}]  }
   0x1   :  { %s17_s14 = sshll.u32 %s1520_s2, 4  ;;  %s19_s16 = sshll.u32 %s995_s15, 4  ;;  %s18_s14 = int_to_ptr.hbm [resolvable:$true] %s17_s14  ;;  %s20_s16 = int_to_ptr.vmem [resolvable:$true] %s19_s16 }
   0x2   :  { %s997_s18 = smov 4  }
   0x3   :  { %25 = dma.hbm_to_vmem [thread:$0]  %s18_s14, 1024, %s20_s16, [#allocation3], %s996_s17, %s996_s17, %s997_s18  }
   0x4   :  { %993 = dma.done.wait [#allocation3], 1024  }
   0x5   :  { %994 = vsyncadd [#allocation3], 4294966272  ;;  %v876_v0 = vld [vmem:[%s1519_s1 + $0x38] sm:$0xff]  ;;  %v875_v1 = vld [vmem:[%s1519_s1 + $0x30] sm:$0xff] }
   0x6   :  { %158 = vmatpush.bf16.msra.mxu0 %v876_v0  ;;  %885 = vmatpush.bf16.msra.mxu2 %v876_v0  ;;  %v874_v2 = vld [vmem:[%s1519_s1 + $0x28] sm:$0xff]  ;;  %v873_v3 = vld [vmem:[%s1519_s1 + $0x20] sm:$0xff]  ;;  %v872_v4 = vld [vmem:[%s1519_s1 + $0x18] sm:$0xff] }
   0x7   :  { %v871_v5 = vld [vmem:[%s1519_s1 + $0x10] sm:$0xff]  ;;  %v870_v6 = vld [vmem:[%s1519_s1 + $0x8] sm:$0xff]  ;;  %v869_v7 = vld [vmem:[%s1519_s1] sm:$0xff] }
   0x8   :  { %v861_v8 = vld [vmem:[%s1518_s0] sm:$0xff]  ;;  %v862_v10 = vld [vmem:[%s1518_s0 + $0x8] sm:$0xff]  ;;  %v863_v12 = vld [vmem:[%s1518_s0 + $0x10] sm:$0xff] }
   0x9   :  { %v865_v9 = vld [vmem:[%s1518_s0 + $0x20] sm:$0xff]  ;;  %v866_v11 = vld [vmem:[%s1518_s0 + $0x28] sm:$0xff]  ;;  %v867_v13 = vld [vmem:[%s1518_s0 + $0x30] sm:$0xff] }
   0xa   :  { %159 = vmatpush.bf16.msra.mxu0 %v875_v1  ;;  %886 = vmatpush.bf16.msra.mxu2 %v875_v1  ;;  %v864_v14 = vld [vmem:[%s1518_s0 + $0x18] sm:$0xff]  ;;  %v883_v17 = vld [vmem:[#allocation2 + $0x30] sm:$0xff]  ;;  %v882_v22 = vld [vmem:[#allocation2 + $0x28] sm:$0xff] }
   0xb   :  { %v868_v15 = vld [vmem:[%s1518_s0 + $0x38] sm:$0xff]  ;;  %v881_v38 = vld [vmem:[#allocation2 + $0x20] sm:$0xff]  ;;  %v879_v59 = vld [vmem:[#allocation2 + $0x10] sm:$0xff] }
   0xc   :  { %v884_v16 = vld [vmem:[#allocation2 + $0x38] sm:$0xff] }
   0xd   :  { %695 = vmatpush.bf16.msra.mxu1 %v884_v16  ;;  %893 = vmatpush.bf16.msra.mxu3 %v884_v16  ;;  %v880_v43 = vld [vmem:[#allocation2 + $0x18] sm:$0xff] }
   0xe   :  { %160 = vmatpush.bf16.msra.mxu0 %v874_v2  ;;  %887 = vmatpush.bf16.msra.mxu2 %v874_v2 }
  0x11   :  { %696 = vmatpush.bf16.msra.mxu1 %v883_v17  ;;  %894 = vmatpush.bf16.msra.mxu3 %v883_v17 }
  0x12   :  { %161 = vmatpush.bf16.msra.mxu0 %v873_v3  ;;  %888 = vmatpush.bf16.msra.mxu2 %v873_v3 }
  0x15   :  { %697 = vmatpush.bf16.msra.mxu1 %v882_v22  ;;  %895 = vmatpush.bf16.msra.mxu3 %v882_v22 }
  0x16   :  { %162 = vmatpush.bf16.msra.mxu0 %v872_v4  ;;  %889 = vmatpush.bf16.msra.mxu2 %v872_v4 }
  0x19   :  { %698 = vmatpush.bf16.msra.mxu1 %v881_v38  ;;  %896 = vmatpush.bf16.msra.mxu3 %v881_v38 }
  0x1a   :  { %163 = vmatpush.bf16.msra.mxu0 %v871_v5  ;;  %890 = vmatpush.bf16.msra.mxu2 %v871_v5 }
  0x1d   :  { %699 = vmatpush.bf16.msra.mxu1 %v880_v43  ;;  %897 = vmatpush.bf16.msra.mxu3 %v880_v43 }
  0x1e   :  { %164 = vmatpush.bf16.msra.mxu0 %v870_v6  ;;  %891 = vmatpush.bf16.msra.mxu2 %v870_v6 }
  0x21   :  { %700 = vmatpush.bf16.msra.mxu1 %v879_v59  ;;  %898 = vmatpush.bf16.msra.mxu3 %v879_v59 }
  0x22   :  { %165 = vmatpush.bf16.msra.mxu0 %v869_v7  ;;  %892 = vmatpush.bf16.msra.mxu2 %v869_v7  ;;  %v878_v7 = vld [vmem:[#allocation2 + $0x8] sm:$0xff] }
  0x25   :  { %166 = vmatmul.bf16.vlgmr.msra.gmra.mxu0 %v861_v8  ;;  %186 = vmatmul.bf16.vlgmr.msra.gmra.mxu2 %v865_v9 }
  0x26   :  { %701 = vmatpush.bf16.msra.mxu1 %v878_v7  ;;  %899 = vmatpush.bf16.msra.mxu3 %v878_v7 }
  0x35   :  { %171 = vmatmul.bf16.gmra.mxu0 %v862_v10  ;;  %191 = vmatmul.bf16.gmra.mxu2 %v866_v11 }
  0x45   :  { %176 = vmatmul.bf16.gmra.mxu0 %v863_v12  ;;  %196 = vmatmul.bf16.gmra.mxu2 %v867_v13 }
  0x55   :  { %181 = vmatmul.bf16.gmra.mxu0 %v864_v14  ;;  %201 = vmatmul.bf16.gmra.mxu2 %v868_v15  ;;  %v998_v14 = vmov -1.0  }
  0xa2   :  { %v1070_v18 = vpop.f32.mrf.mxu0 }
  0xa3   :  { %v1073_v19 = vmul.f32 0.70710677, %v1070_v18  ;;  %v1145_v8 = vmul.f32 0.5, %v1070_v18 }
  0xa5   :  { %v271_v20 = vand.u32 2147483647, %v1073_v19  ;;  %vm239_vm0 = vcmp.ge.f32.partialorder %v1073_v19, 0.0 }
  0xa6   :  { %v1157_v15 = vsel %vm239_vm0, 1.0, %v998_v14 }
  0xa7   :  { %v287_v21 = vmul.f32 0.3275911, %v271_v20  ;;  %v479_v57 = vsub.f32 0.0, %v271_v20 }
  0xa8   :  { %v1076_v23 = vpop.f32.mrf.mxu2 }
  0xa9   :  { %v303_v24 = vadd.f32 1.0, %v287_v21  ;;  %v1079_v25 = vmul.f32 0.70710677, %v1076_v23  ;;  %v495_v4 = vmul.f32 %v479_v57, %v271_v20  ;;  %v1162_v21 = vmul.f32 0.5, %v1076_v23 }
  0xaa   :  { %v1081_v26 = vpop.f32.mrf.mxu0 }
  0xab   :  { %905 = vrcp.f32 %v303_v24  ;;  %v1084_v27 = vand.u32 2147483647, %v1079_v25  ;;  %v1087_v28 = vmul.f32 0.70710677, %v1081_v26  ;;  %vm247_vm1 = vcmp.ge.f32.partialorder %v1079_v25, 0.0 }
  0xac   :  { %v511_v20 = vmul.f32 1.442695, %v495_v4  ;;  %v1170_v19 = vsel %vm247_vm1, 1.0, %v998_v14 }
  0xad   :  { %v295_v29 = vmul.f32 0.3275911, %v1084_v27  ;;  %v1091_v30 = vand.u32 2147483647, %v1087_v28  ;;  %v487_v1 = vsub.f32 0.0, %v1084_v27  ;;  %vm240_vm2 = vcmp.ge.f32.partialorder %v1087_v28, 0.0 }
  0xaf   :  { %v311_v31 = vadd.f32 1.0, %v295_v29  ;;  %v288_v32 = vmul.f32 0.3275911, %v1091_v30  ;;  %v480_v9 = vsub.f32 0.0, %v1091_v30  ;;  %v503_v16 = vmul.f32 %v487_v1, %v1084_v27 }
  0xb0   :  { %v1094_v33 = vpop.f32.mrf.mxu2  ;;  %v1173_v27 = vmul.f32 0.5, %v1081_v26 }
  0xb1   :  { %v1096_v34 = vpop.eup %905  ;;  %v1099_v35 = vmul.f32 0.70710677, %v1094_v33  ;;  %907 = vrcp.f32 %v311_v31  ;;  %v304_v36 = vadd.f32 1.0, %v288_v32  ;;  %v877_v31 = vld [vmem:[#allocation2] sm:$0xff]  ;;  %v496_v32 = vmul.f32 %v480_v9, %v1091_v30 }
  0xb2   :  { %v1101_v37 = vpop.f32.mrf.mxu0  ;;  %v335_v39 = vmul.f32 1.0614054, %v1096_v34  ;;  %702 = vmatpush.bf16.msra.mxu1 %v877_v31  ;;  %900 = vmatpush.bf16.msra.mxu3 %v877_v31 }
  0xb3   :  { %v1105_v40 = vand.u32 2147483647, %v1099_v35  ;;  %909 = vrcp.f32 %v304_v36  ;;  %v1109_v42 = vmul.f32 0.70710677, %v1101_v37  ;;  %v513_v59 = vmul.f32 1.442695, %v496_v32 }
  0xb4   :  { %v351_v44 = vadd.f32 -1.4531521, %v335_v39  ;;  %vm248_vm3 = vcmp.ge.f32.partialorder %v1099_v35, 0.0  ;;  %v1207_v1 = vmul.f32 0.5, %v1101_v37 }
  0xb5   :  { %v296_v41 = vmul.f32 0.3275911, %v1105_v40  ;;  %v1112_v46 = vand.u32 2147483647, %v1109_v42  ;;  %v488_v43 = vsub.f32 0.0, %v1105_v40  ;;  %v1213_v35 = vsel %vm248_vm3, 1.0, %v998_v14 }
  0xb6   :  { %v367_v52 = vmul.f32 %v1096_v34, %v351_v44  ;;  %vm241_vm4 = vcmp.ge.f32.partialorder %v1109_v42, 0.0 }
  0xb7   :  { %v312_v45 = vadd.f32 1.0, %v296_v41  ;;  %v1114_v47 = vpop.eup %907  ;;  %v289_v49 = vmul.f32 0.3275911, %v1112_v46  ;;  %v527_v41 = vmul.f32 1.442695, %v503_v16  ;;  %v504_v28 = vmul.f32 %v488_v43, %v1105_v40 }
  0xb8   :  { %v1116_v48 = vpop.f32.mrf.mxu2  ;;  %v343_v53 = vmul.f32 1.0614054, %v1114_v47  ;;  %v383_v62 = vadd.f32 1.4214138, %v367_v52  ;;  %v1192_v52 = vmul.f32 0.5, %v1094_v33 }
  0xb9   :  { %911 = vrcp.f32 %v312_v45  ;;  %v1119_v50 = vpop.eup %909  ;;  %v1122_v51 = vmul.f32 0.70710677, %v1116_v48  ;;  %v305_v54 = vadd.f32 1.0, %v289_v49  ;;  %v481_v45 = vsub.f32 0.0, %v1112_v46 }
  0xba   :  { %v1129_v56 = vpop.f32.mrf.mxu0  ;;  %v336_v58 = vmul.f32 1.0614054, %v1119_v50  ;;  %v359_v63 = vadd.f32 -1.4531521, %v343_v53  ;;  %v399_v11 = vmul.f32 %v1096_v34, %v383_v62  ;;  %v1189_v49 = vsel %vm240_vm2, 1.0, %v998_v14 }
  0xbb   :  { %v1127_v55 = vand.u32 2147483647, %v1122_v51  ;;  %913 = vrcp.f32 %v305_v54  ;;  %v1136_v0 = vmul.f32 0.70710677, %v1129_v56  ;;  %vm249_vm5 = vcmp.ge.f32.partialorder %v1122_v51, 0.0 }
  0xbc   :  { %v352_v5 = vadd.f32 -1.4531521, %v336_v58  ;;  %v375_v12 = vmul.f32 %v1114_v47, %v359_v63  ;;  %v415_v23 = vadd.f32 -0.28449672, %v399_v11 }
  0xbd   :  { %v297_v60 = vmul.f32 0.3275911, %v1127_v55  ;;  %v1142_v6 = vand.u32 2147483647, %v1136_v0  ;;  %vm242_vm6 = vcmp.ge.f32.partialorder %v1136_v0, 0.0 }
  0xbe   :  { %v368_v22 = vmul.f32 %v1119_v50, %v352_v5  ;;  %v391_v36 = vadd.f32 1.4214138, %v375_v12  ;;  %v431_v57 = vmul.f32 %v1096_v34, %v415_v23 }
  0xbf   :  { %v1133_v61 = vpop.eup %911  ;;  %v313_v3 = vadd.f32 1.0, %v297_v60  ;;  %v290_v13 = vmul.f32 0.3275911, %v1142_v6 }
  0xc0   :  { %v344_v2 = vmul.f32 1.0614054, %v1133_v61  ;;  %v1165_v29 = vpop.f32.mrf.mxu2  ;;  %v384_v44 = vadd.f32 1.4214138, %v368_v22  ;;  %v407_v58 = vmul.f32 %v1114_v47, %v391_v36  ;;  %v447_v11 = vadd.f32 0.2548296, %v431_v57 }
  0xc1   :  { %915 = vrcp.f32 %v313_v3  ;;  %v1148_v10 = vpop.eup %913  ;;  %v306_v24 = vadd.f32 1.0, %v290_v13  ;;  %v1182_v26 = vmul.f32 0.70710677, %v1165_v29  ;;  %v497_v3 = vmul.f32 %v481_v45, %v1112_v46 }
  0xc2   :  { %v360_v17 = vadd.f32 -1.4531521, %v344_v2  ;;  %v337_v18 = vmul.f32 1.0614054, %v1148_v10  ;;  %v400_v63 = vmul.f32 %v1119_v50, %v384_v44  ;;  %v1210_v4 = vpop.f32.mrf.mxu0  ;;  %v423_v12 = vadd.f32 -0.28449672, %v407_v58 }
  0xc3   :  { %917 = vrcp.f32 %v306_v24  ;;  %v1196_v54 = vand.u32 2147483647, %v1182_v26  ;;  %v529_v13 = vmul.f32 1.442695, %v504_v28  ;;  %v1224_v24 = vsel %vm241_vm4, 1.0, %v998_v14 }
  0xc4   :  { %v353_v38 = vadd.f32 -1.4531521, %v337_v18  ;;  %v376_v25 = vmul.f32 %v1133_v61, %v360_v17  ;;  %919 = vpow2.f32 %v511_v20  ;;  %v416_v46 = vadd.f32 -0.28449672, %v400_v63 }
  0xc5   :  { %921 = vpow2.f32 %v527_v41  ;;  %v298_v62 = vmul.f32 0.3275911, %v1196_v54  ;;  %v515_v17 = vmul.f32 1.442695, %v497_v3  ;;  %v489_v18 = vsub.f32 0.0, %v1127_v55 }
  0xc6   :  { %v369_v30 = vmul.f32 %v1148_v10, %v353_v38  ;;  %v392_v60 = vadd.f32 1.4214138, %v376_v25  ;;  %923 = vpow2.f32 %v513_v59  ;;  %v1228_v32 = vmul.f32 0.70710677, %v1210_v4 }
  0xc7   :  { %v1177_v39 = vpop.eup %915  ;;  %v314_v7 = vadd.f32 1.0, %v298_v62  ;;  %v463_v51 = vmul.f32 %v1096_v34, %v447_v11  ;;  %v439_v23 = vmul.f32 %v1114_v47, %v423_v12  ;;  %v1233_v36 = vmul.f32 0.5, %v1116_v48 }
  0xc8   :  { %v345_v53 = vmul.f32 1.0614054, %v1177_v39  ;;  %v385_v2 = vadd.f32 1.4214138, %v369_v30  ;;  %v408_v37 = vmul.f32 %v1133_v61, %v392_v60  ;;  %v1221_v20 = vpop.f32.mrf.mxu2  ;;  %v1236_v38 = vsel %vm249_vm5, 1.0, %v998_v14 }
  0xc9   :  { %v1203_v33 = vpop.eup %917  ;;  %925 = vrcp.f32 %v314_v7  ;;  %v1239_v25 = vand.u32 2147483647, %v1228_v32  ;;  %v1242_v43 = vmul.f32 0.70710677, %v1221_v20  ;;  %v432_v30 = vmul.f32 %v1119_v50, %v416_v46 }
  0xca   :  { %v361_v5 = vadd.f32 -1.4531521, %v345_v53  ;;  %v338_v40 = vmul.f32 1.0614054, %v1203_v33  ;;  %v920_v9 = vpop.eup %919  ;;  %v401_v16 = vmul.f32 %v1148_v10, %v385_v2  ;;  %v424_v41 = vadd.f32 -0.28449672, %v408_v37  ;;  %v1255_v63 = vpop.f32.mrf.mxu0 }
  0xcb   :  { %v922_v22 = vpop.eup %921  ;;  %927 = vpow2.f32 %v529_v13  ;;  %v505_v45 = vmul.f32 %v489_v18, %v1127_v55  ;;  %v1249_v57 = vmul.f32 0.5, %v1129_v56  ;;  %v291_v59 = vmul.f32 0.3275911, %v1239_v25 }
  0xcc   :  { %v377_v42 = vmul.f32 %v1177_v39, %v361_v5  ;;  %v354_v31 = vadd.f32 -1.4531521, %v338_v40  ;;  %v924_v44 = vpop.eup %923  ;;  %v417_v34 = vadd.f32 -0.28449672, %v401_v16  ;;  %929 = vpow2.f32 %v515_v17 }
  0xcd   :  { %v543_v60 = vmul.f32 %v920_v9, %v463_v51  ;;  %v455_v28 = vadd.f32 0.2548296, %v439_v23  ;;  %v440_v55 = vmul.f32 %v1133_v61, %v424_v41  ;;  %v482_v2 = vsub.f32 0.0, %v1142_v6 }
  0xce   :  { %v393_v53 = vadd.f32 1.4214138, %v377_v42  ;;  %v370_v58 = vmul.f32 %v1203_v33, %v354_v31  ;;  %v307_v3 = vadd.f32 1.0, %v291_v59  ;;  %v1260_v56 = vand.u32 2147483647, %v1242_v43 }
  0xcf   :  { %v1246_v48 = vpop.eup %925  ;;  %v448_v5 = vadd.f32 0.2548296, %v432_v30  ;;  %v433_v40 = vmul.f32 %v1148_v10, %v417_v34  ;;  %v531_v7 = vmul.f32 1.442695, %v505_v45  ;;  %v559_v16 = vsub.f32 1.0, %v543_v60 }
  0xd0   :  { %v346_v62 = vmul.f32 1.0614054, %v1246_v48  ;;  %v409_v12 = vmul.f32 %v1177_v39, %v393_v53  ;;  %v386_v37 = vadd.f32 1.4214138, %v370_v58  ;;  %931 = vrcp.f32 %v307_v3  ;;  %v1278_v45 = vpop.f32.mrf.mxu2 }
  0xd1   :  { %v928_v11 = vpop.eup %927  ;;  %v299_v13 = vmul.f32 0.3275911, %v1260_v56  ;;  %v471_v17 = vmul.f32 %v1114_v47, %v455_v28  ;;  %v1269_v18 = vsel %vm242_vm6, 1.0, %v998_v14  ;;  %v456_v31 = vadd.f32 0.2548296, %v440_v55 }
  0xd2   :  { %v362_v9 = vadd.f32 -1.4531521, %v346_v62  ;;  %v930_v46 = vpop.eup %929  ;;  %v498_v51 = vmul.f32 %v482_v2, %v1142_v6  ;;  %v1274_v41 = vmul.f32 0.70710677, %v1255_v63  ;;  %v464_v30 = vmul.f32 %v1119_v50, %v448_v5 }
  0xd3   :  { %v315_v23 = vadd.f32 1.0, %v299_v13  ;;  %v449_v34 = vadd.f32 0.2548296, %v433_v40  ;;  %933 = vpow2.f32 %v531_v7  ;;  %v490_v47 = vsub.f32 0.0, %v1196_v54 }
  0xd4   :  { %v378_v42 = vmul.f32 %v1246_v48, %v362_v9  ;;  %v425_v0 = vadd.f32 -0.28449672, %v409_v12  ;;  %v402_v53 = vmul.f32 %v1203_v33, %v386_v37  ;;  %v1282_v58 = vand.u32 2147483647, %v1274_v41 }
  0xd5   :  { %935 = vrcp.f32 %v315_v23  ;;  %v1285_v6 = vmul.f32 %v559_v16, %v1157_v15  ;;  %v551_v59 = vmul.f32 %v922_v22, %v471_v17  ;;  %v1288_v60 = vmul.f32 0.5, %v1165_v29  ;;  %v1300_v29 = vpop.f32.mrf.mxu0 }
  0xd6   :  { %v394_v50 = vadd.f32 1.4214138, %v378_v42  ;;  %v1290_v28 = vpop.eup %931  ;;  %v472_v62 = vmul.f32 %v1133_v61, %v456_v31  ;;  %v517_v55 = vmul.f32 1.442695, %v498_v51  ;;  %v292_v2 = vmul.f32 0.3275911, %v1282_v58 }
  0xd7   :  { %v1295_v3 = vmul.f32 0.70710677, %v1278_v45  ;;  %v544_v5 = vmul.f32 %v924_v44, %v464_v30  ;;  %v465_v40 = vmul.f32 %v1148_v10, %v449_v34  ;;  %vm250_vm7 = vcmp.ge.f32.partialorder %v1182_v26, 0.0 }
  0xd8   :  { %v339_v15 = vmul.f32 1.0614054, %v1290_v28  ;;  %v441_v22 = vmul.f32 %v1177_v39, %v425_v0  ;;  %v418_v7 = vadd.f32 -0.28449672, %v402_v53  ;;  %v506_v61 = vmul.f32 %v490_v47, %v1196_v54 }
  0xd9   :  { %v308_v9 = vadd.f32 1.0, %v292_v2  ;;  %v934_v12 = vpop.eup %933  ;;  %v567_v37 = vsub.f32 1.0, %v551_v59  ;;  %v410_v13 = vmul.f32 %v1246_v48, %v394_v50  ;;  %v1306_v44 = vand.u32 2147483647, %v1295_v3 }
  0xda   :  { %v355_v16 = vadd.f32 -1.4531521, %v339_v15  ;;  %v552_v17 = vmul.f32 %v928_v11, %v472_v62  ;;  %v483_v42 = vsub.f32 0.0, %v1239_v25  ;;  %v1312_v31 = vmul.f32 0.70710677, %v1300_v29 }
  0xdb   :  { %v1308_v10 = vpop.eup %935  ;;  %937 = vrcp.f32 %v308_v9  ;;  %v560_v51 = vsub.f32 1.0, %v544_v5  ;;  %v545_v54 = vmul.f32 %v930_v46, %v465_v40  ;;  %v300_v30 = vmul.f32 0.3275911, %v1306_v44 }
  0xdc   :  { %v371_v23 = vmul.f32 %v1290_v28, %v355_v16  ;;  %v457_v34 = vadd.f32 0.2548296, %v441_v22  ;;  %v434_v47 = vmul.f32 %v1203_v33, %v418_v7  ;;  %v533_v0 = vmul.f32 1.442695, %v506_v61 }
  0xdd   :  { %v1318_v53 = vand.u32 2147483647, %v1312_v31  ;;  %939 = vpow2.f32 %v517_v55  ;;  %v426_v11 = vadd.f32 -0.28449672, %v410_v13  ;;  %v347_v59 = vmul.f32 1.0614054, %v1308_v10  ;;  %v1331_v55 = vpop.f32.mrf.mxu2 }
  0xde   :  { %v316_v50 = vadd.f32 1.0, %v300_v30  ;;  %v568_v62 = vsub.f32 1.0, %v552_v17  ;;  %v1324_v46 = vsel %vm250_vm7, 1.0, %v998_v14  ;;  %v499_v2 = vmul.f32 %v483_v42, %v1239_v25 }
  0xdf   :  { %v293_v5 = vmul.f32 0.3275911, %v1318_v53  ;;  %v1329_v40 = vmul.f32 %v567_v37, %v1170_v19  ;;  %v561_v15 = vsub.f32 1.0, %v545_v54  ;;  %v387_v22 = vadd.f32 1.4214138, %v371_v23 }
  0xe0   :  { %941 = vrcp.f32 %v316_v50  ;;  %v576_v61 = vmul.f32 %v560_v51, %v1189_v49  ;;  %v473_v26 = vmul.f32 %v1177_v39, %v457_v34  ;;  %v450_v9 = vadd.f32 0.2548296, %v434_v47 }
  0xe1   :  { %v1333_v7 = vpop.eup %937  ;;  %v309_v13 = vadd.f32 1.0, %v293_v5  ;;  %v442_v25 = vmul.f32 %v1246_v48, %v426_v11  ;;  %943 = vpow2.f32 %v533_v0  ;;  %v363_v16 = vadd.f32 -1.4531521, %v347_v59 }
  0xe2   :  { %v484_v19 = vsub.f32 0.0, %v1282_v58  ;;  %v584_v37 = vmul.f32 %v568_v62, %v1213_v35  ;;  %v519_v17 = vmul.f32 1.442695, %v499_v2  ;;  %v340_v42 = vmul.f32 1.0614054, %v1333_v7 }
  0xe3   :  { %v1342_v54 = vmul.f32 0.70710677, %v1331_v55  ;;  %v940_v23 = vpop.eup %939  ;;  %v1345_v49 = vmul.f32 %v561_v15, %v1224_v24  ;;  %v403_v39 = vmul.f32 %v1290_v28, %v387_v22  ;;  %945 = vrcp.f32 %v309_v13 }
  0xe4   :  { %v591_v51 = vadd.f32 1.0, %v1285_v6  ;;  %v1349_v30 = vmul.f32 %v934_v12, %v473_v26  ;;  %v466_v34 = vmul.f32 %v1203_v33, %v450_v9  ;;  %v356_v35 = vadd.f32 -1.4531521, %v340_v42 }
  0xe5   :  { %v1353_v47 = vand.u32 2147483647, %v1342_v54  ;;  %v458_v11 = vadd.f32 0.2548296, %v442_v25  ;;  %v379_v59 = vmul.f32 %v1308_v10, %v363_v16  ;;  %v500_v24 = vmul.f32 %v484_v19, %v1282_v58 }
  0xe6   :  { %v1355_v0 = vpop.eup %941  ;;  %v592_v50 = vadd.f32 1.0, %v576_v61  ;;  %v491_v62 = vsub.f32 0.0, %v1260_v56  ;;  %v372_v6 = vmul.f32 %v1333_v7, %v356_v35  ;;  %v419_v5 = vadd.f32 -0.28449672, %v403_v39  ;;  %v1365_v61 = vpop.f32.mrf.mxu0 }
  0xe7   :  { %v348_v12 = vmul.f32 1.0614054, %v1355_v0  ;;  %v301_v33 = vmul.f32 0.3275911, %v1353_v47  ;;  %v944_v2 = vpop.eup %943  ;;  %947 = vpow2.f32 %v519_v17  ;;  %v607_v15 = vmul.f32 %v591_v51, %v1145_v8 }
  0xe8   :  { %v608_v22 = vmul.f32 %v592_v50, %v1173_v27  ;;  %v546_v26 = vmul.f32 %v940_v23, %v466_v34  ;;  %v388_v9 = vadd.f32 1.4214138, %v372_v6  ;;  %v474_v16 = vmul.f32 %v1246_v48, %v458_v11 }
  0xe9   :  { %v364_v13 = vadd.f32 -1.4531521, %v348_v12  ;;  %v317_v58 = vadd.f32 1.0, %v301_v33  ;;  %v1367_v25 = vpop.eup %945  ;;  %v395_v19 = vadd.f32 1.4214138, %v379_v59  ;;  %v569_v27 = vsub.f32 1.0, %v1349_v30 }
  0xea   :  { %v521_v42 = vmul.f32 1.442695, %v500_v24  ;;  %v623_v35 = vpack.c.bf16 %v608_v22, %v607_v15  ;;  %v404_v39 = vmul.f32 %v1333_v7, %v388_v9  ;;  %v341_v8 = vmul.f32 1.0614054, %v1367_v25 }
  0xeb   :  { %v380_v17 = vmul.f32 %v1355_v0, %v364_v13  ;;  %949 = vrcp.f32 %v317_v58  ;;  %v435_v23 = vmul.f32 %v1290_v28, %v419_v5  ;;  %v492_v51 = vsub.f32 0.0, %v1306_v44 }
  0xec   :  { %703 = vmatmul.bf16.vlgmr.msra.gmra.mxu1 %v623_v35  ;;  %v1377_v34 = vmul.f32 0.70710677, %v1365_v61  ;;  %v507_v48 = vmul.f32 %v491_v62, %v1260_v56  ;;  %v420_v11 = vadd.f32 -0.28449672, %v404_v39  ;;  %v357_v24 = vadd.f32 -1.4531521, %v341_v8 }
  0xed   :  { %v396_v59 = vadd.f32 1.4214138, %v380_v17  ;;  %v948_v50 = vpop.eup %947  ;;  %v562_v6 = vsub.f32 1.0, %v546_v26  ;;  %v411_v12 = vmul.f32 %v1308_v10, %v395_v19  ;;  %vm244_vm8 = vcmp.ge.f32.partialorder %v1274_v41, 0.0 }
  0xee   :  { %951 = vpow2.f32 %v521_v42  ;;  %v554_v30 = vmul.f32 %v944_v2, %v474_v16  ;;  %v436_v33 = vmul.f32 %v1333_v7, %v420_v11  ;;  %v373_v15 = vmul.f32 %v1367_v25, %v357_v24 }
  0xef   :  { %v412_v5 = vmul.f32 %v1355_v0, %v396_v59  ;;  %v451_v22 = vadd.f32 0.2548296, %v435_v23  ;;  %v1386_v56 = vand.u32 2147483647, %v1377_v34  ;;  %v599_v62 = vadd.f32 1.0, %v1329_v40  ;;  %v1401_v59 = vpop.f32.mrf.mxu2 }
  0xf0   :  { %v600_v9 = vadd.f32 1.0, %v584_v37  ;;  %v452_v13 = vadd.f32 0.2548296, %v436_v33  ;;  %v508_v19 = vmul.f32 %v492_v51, %v1306_v44  ;;  %v389_v2 = vadd.f32 1.4214138, %v373_v15 }
  0xf1   :  { %v1389_v26 = vpop.eup %949  ;;  %v428_v58 = vadd.f32 -0.28449672, %v412_v5  ;;  %v578_v16 = vmul.f32 %v562_v6, %v1269_v18  ;;  %v427_v42 = vadd.f32 -0.28449672, %v411_v12  ;;  %v294_v39 = vmul.f32 0.3275911, %v1386_v56 }
  0xf2   :  { %v349_v35 = vmul.f32 1.0614054, %v1389_v26  ;;  %v570_v17 = vsub.f32 1.0, %v554_v30  ;;  %v468_v8 = vmul.f32 %v1333_v7, %v452_v13  ;;  %v485_v37 = vsub.f32 0.0, %v1318_v53 }
  0xf3   :  { %v444_v40 = vmul.f32 %v1355_v0, %v428_v58  ;;  %vm243_vm9 = vcmp.ge.f32.partialorder %v1228_v32, 0.0  ;;  %v310_v44 = vadd.f32 1.0, %v294_v39  ;;  %v615_v51 = vmul.f32 %v599_v62, %v1162_v21 }
  0xf4   :  { %v952_v23 = vpop.eup %951  ;;  %v365_v11 = vadd.f32 -1.4531521, %v349_v35  ;;  %v616_v18 = vmul.f32 %v600_v9, %v1192_v52  ;;  %v467_v24 = vmul.f32 %v1290_v28, %v451_v22  ;;  %v535_v6 = vmul.f32 1.442695, %v507_v48 }
  0xf5   :  { %v537_v12 = vmul.f32 1.442695, %v508_v19  ;;  %v405_v7 = vmul.f32 %v1367_v25, %v389_v2  ;;  %v443_v30 = vmul.f32 %v1308_v10, %v427_v42  ;;  %953 = vrcp.f32 %v310_v44 }
  0xf6   :  { %v381_v33 = vmul.f32 %v1389_v26, %v365_v11  ;;  %v627_v5 = vpack.c.bf16 %v616_v18, %v615_v51  ;;  %v585_v15 = vmul.f32 %v569_v27, %v1236_v38  ;;  %v548_v13 = vmul.f32 %v952_v23, %v468_v8 }
  0xf7   :  { %v501_v21 = vmul.f32 %v485_v37, %v1318_v53  ;;  %v1410_v52 = vmul.f32 0.70710677, %v1401_v59  ;;  %v586_v28 = vmul.f32 %v570_v17, %v1324_v46  ;;  %v460_v48 = vadd.f32 0.2548296, %v444_v40 }
  0xf8   :  { %723 = vmatmul.bf16.vlgmr.msra.gmra.mxu3 %v627_v5  ;;  %v593_v22 = vadd.f32 1.0, %v1345_v49  ;;  %v594_v62 = vadd.f32 1.0, %v578_v16  ;;  %v547_v9 = vmul.f32 %v948_v50, %v467_v24  ;;  %v260_v58 = vsel %vm244_vm8, 1.0, %v998_v14 }
  0xf9   :  { %955 = vpow2.f32 %v537_v12  ;;  %v421_v38 = vadd.f32 -0.28449672, %v405_v7  ;;  %v459_v27 = vadd.f32 0.2548296, %v443_v30  ;;  %v397_v53 = vadd.f32 1.4214138, %v381_v33 }
  0xfa   :  { %957 = vpow2.f32 %v535_v6  ;;  %v1418_v19 = vand.u32 2147483647, %v1410_v52  ;;  %v564_v2 = vsub.f32 1.0, %v548_v13  ;;  %v523_v46 = vmul.f32 1.442695, %v501_v21 }
  0xfb   :  { %v609_v42 = vmul.f32 %v593_v22, %v1207_v1  ;;  %v610_v49 = vmul.f32 %v594_v62, %v1249_v57  ;;  %v1422_v16 = vpop.eup %953  ;;  %v476_v50 = vmul.f32 %v1355_v0, %v460_v48  ;;  %v486_v41 = vsub.f32 0.0, %v1386_v56 }
  0xfc   :  { %v302_v35 = vmul.f32 0.3275911, %v1418_v19  ;;  %v602_v39 = vadd.f32 1.0, %v586_v28  ;;  %v563_v17 = vsub.f32 1.0, %v547_v9  ;;  %v437_v8 = vmul.f32 %v1367_v25, %v421_v38 }
  0xfd   :  { %v342_v40 = vmul.f32 1.0614054, %v1422_v16  ;;  %v624_v37 = vpack.c.bf16 %v610_v49, %v609_v42  ;;  %v475_v23 = vmul.f32 %v1308_v10, %v459_v27  ;;  %v413_v1 = vmul.f32 %v1389_v26, %v397_v53 }
  0xfe   :  { %v318_v57 = vadd.f32 1.0, %v302_v35  ;;  %v601_v11 = vadd.f32 1.0, %v585_v15  ;;  %v259_v0 = vsel %vm243_vm9, 1.0, %v998_v14  ;;  %v580_v51 = vmul.f32 %v564_v2, %v260_v58 }
  0xff   :  { %v956_v44 = vpop.eup %955  ;;  %v493_v18 = vsub.f32 0.0, %v1353_v47  ;;  %v358_v24 = vadd.f32 -1.4531521, %v342_v40  ;;  %708 = vmatmul.bf16.gmra.mxu1 %v624_v37  ;;  %v502_v7 = vmul.f32 %v486_v41, %v1386_v56  ;;  %v618_v10 = vmul.f32 %v602_v39, %v1288_v60 }
 0x100   :  { %v958_v6 = vpop.eup %957  ;;  %v556_v12 = vmul.f32 %v956_v44, %v476_v50  ;;  %959 = vrcp.f32 %v318_v57  ;;  %v211_v30 = vmul.f32 0.5, %v1210_v4  ;;  %v579_v33 = vmul.f32 %v563_v17, %v259_v0 }
 0x101   :  { %v453_v5 = vadd.f32 0.2548296, %v437_v8  ;;  %v374_v15 = vmul.f32 %v1422_v16, %v358_v24  ;;  %v555_v32 = vmul.f32 %v958_v6, %v475_v23  ;;  %961 = vpow2.f32 %v523_v46 }
 0x102   :  { %v429_v13 = vadd.f32 -0.28449672, %v413_v1  ;;  %v617_v21 = vmul.f32 %v601_v11, %v1233_v36  ;;  %vm252_vm10 = vcmp.ge.f32.partialorder %v1295_v3, 0.0  ;;  %v509_v28 = vmul.f32 %v493_v18, %v1353_v47 }
 0x103   :  { %v390_v48 = vadd.f32 1.4214138, %v374_v15  ;;  %v596_v56 = vadd.f32 1.0, %v580_v51  ;;  %vm251_vm11 = vcmp.ge.f32.partialorder %v1242_v43, 0.0  ;;  %v572_v60 = vsub.f32 1.0, %v556_v12 }
 0x104   :  { %v525_v22 = vmul.f32 1.442695, %v502_v7  ;;  %v628_v4 = vpack.c.bf16 %v618_v10, %v617_v21  ;;  %v212_v62 = vmul.f32 0.5, %v1255_v63  ;;  %v469_v9 = vmul.f32 %v1367_v25, %v453_v5 }
 0x105   :  { %v406_v58 = vmul.f32 %v1422_v16, %v390_v48  ;;  %v595_v38 = vadd.f32 1.0, %v579_v33  ;;  %v571_v36 = vsub.f32 1.0, %v555_v32  ;;  %v268_v3 = vsel %vm252_vm10, 1.0, %v998_v14 }
 0x106   :  { %v960_v27 = vpop.eup %959  ;;  %v445_v47 = vmul.f32 %v1389_v26, %v429_v13  ;;  %v494_v53 = vsub.f32 0.0, %v1418_v19  ;;  %v539_v2 = vmul.f32 1.442695, %v509_v28  ;;  %v612_v49 = vmul.f32 %v596_v56, %v212_v62 }
 0x107   :  { %v422_v46 = vadd.f32 -0.28449672, %v406_v58  ;;  %v350_v42 = vmul.f32 1.0614054, %v960_v27  ;;  %v962_v50 = vpop.eup %961  ;;  %v267_v63 = vsel %vm251_vm11, 1.0, %v998_v14  ;;  %v588_v25 = vmul.f32 %v572_v60, %v268_v3 }
 0x108   :  { %963 = vpow2.f32 %v525_v22  ;;  %728 = vmatmul.bf16.gmra.mxu3 %v628_v4  ;;  %v549_v41 = vmul.f32 %v962_v50, %v469_v9  ;;  %v611_v17 = vmul.f32 %v595_v38, %v211_v30  ;;  %v587_v8 = vmul.f32 %v571_v36, %v267_v63 }
 0x109   :  { %v438_v35 = vmul.f32 %v1422_v16, %v422_v46  ;;  %v366_v39 = vadd.f32 -1.4531521, %v350_v42  ;;  %v461_v40 = vadd.f32 0.2548296, %v445_v47  ;;  %v510_v37 = vmul.f32 %v494_v53, %v1418_v19 }
 0x10a   :  { %965 = vpow2.f32 %v539_v2  ;;  %v625_v57 = vpack.c.bf16 %v612_v49, %v611_v17  ;;  %v604_v11 = vadd.f32 1.0, %v588_v25  ;;  %vm245_vm12 = vcmp.ge.f32.partialorder %v1312_v31, 0.0 }
 0x10b   :  { %v454_v23 = vadd.f32 0.2548296, %v438_v35  ;;  %v382_v1 = vmul.f32 %v960_v27, %v366_v39  ;;  %v565_v43 = vsub.f32 1.0, %v549_v41  ;;  %v220_v18 = vmul.f32 0.5, %v1278_v45 }
 0x10c   :  { %v477_v24 = vmul.f32 %v1389_v26, %v461_v40  ;;  %v541_v6 = vmul.f32 1.442695, %v510_v37  ;;  %v603_v12 = vadd.f32 1.0, %v587_v8  ;;  %vm246_vm13 = vcmp.ge.f32.partialorder %v1377_v34, 0.0 }
 0x10d   :  { %v470_v44 = vmul.f32 %v1422_v16, %v454_v23  ;;  %v398_v0 = vadd.f32 1.4214138, %v382_v1  ;;  %v219_v10 = vmul.f32 0.5, %v1221_v20  ;;  %v261_v31 = vsel %vm245_vm12, 1.0, %v998_v14 }
 0x10e   :  { %v964_v51 = vpop.eup %963  ;;  %v620_v30 = vmul.f32 %v604_v11, %v220_v18  ;;  %v581_v16 = vmul.f32 %v565_v43, %v261_v31  ;;  %v262_v45 = vsel %vm246_vm13, 1.0, %v998_v14  ;;  %967 = vpow2.f32 %v541_v6 }
 0x10f   :  { %v550_v19 = vmul.f32 %v964_v51, %v470_v44  ;;  %v414_v7 = vmul.f32 %v960_v27, %v398_v0  ;;  %713 = vmatmul.bf16.gmra.mxu1 %v625_v57  ;;  %v619_v26 = vmul.f32 %v603_v12, %v219_v10  ;;  %v214_v28 = vmul.f32 0.5, %v1365_v61 }
 0x110   :  { %v966_v33 = vpop.eup %965  ;;  %v597_v20 = vadd.f32 1.0, %v581_v16  ;;  %vm253_vm14 = vcmp.ge.f32.partialorder %v1342_v54, 0.0  ;;  %v213_v22 = vmul.f32 0.5, %v1300_v29  ;;  %vm254_vm15 = vcmp.ge.f32.partialorder %v1410_v52, 0.0 }
 0x111   :  { %v566_v5 = vsub.f32 1.0, %v550_v19  ;;  %v430_v15 = vadd.f32 -0.28449672, %v414_v7  ;;  %v557_v32 = vmul.f32 %v966_v33, %v477_v24  ;;  %v629_v34 = vpack.c.bf16 %v620_v30, %v619_v26 }
 0x112   :  { %v269_v58 = vsel %vm253_vm14, 1.0, %v998_v14  ;;  %v613_v36 = vmul.f32 %v597_v20, %v213_v22  ;;  %v270_v53 = vsel %vm254_vm15, 1.0, %v998_v14  ;;  %v222_v46 = vmul.f32 0.5, %v1401_v59 }
 0x113   :  { %v582_v13 = vmul.f32 %v566_v5, %v262_v45  ;;  %v446_v21 = vmul.f32 %v960_v27, %v430_v15  ;;  %v573_v60 = vsub.f32 1.0, %v557_v32 }
 0x114   :  { %v968_v9 = vpop.eup %967 }
 0x115   :  { %v598_v48 = vadd.f32 1.0, %v582_v13  ;;  %v462_v56 = vadd.f32 0.2548296, %v446_v21  ;;  %v589_v3 = vmul.f32 %v573_v60, %v269_v58 }
 0x117   :  { %v614_v4 = vmul.f32 %v598_v48, %v214_v28  ;;  %v478_v62 = vmul.f32 %v960_v27, %v462_v56  ;;  %v605_v54 = vadd.f32 1.0, %v589_v3  ;;  %v221_v27 = vmul.f32 0.5, %v1331_v55 }
 0x118   :  { %733 = vmatmul.bf16.gmra.mxu3 %v629_v34 }
 0x119   :  { %v558_v38 = vmul.f32 %v968_v9, %v478_v62  ;;  %v626_v47 = vpack.c.bf16 %v614_v4, %v613_v36  ;;  %v621_v49 = vmul.f32 %v605_v54, %v221_v27 }
 0x11b   :  { %v574_v61 = vsub.f32 1.0, %v558_v38 }
 0x11d   :  { %v590_v2 = vmul.f32 %v574_v61, %v270_v53 }
 0x11f   :  { %v606_v29 = vadd.f32 1.0, %v590_v2  ;;  %718 = vmatmul.bf16.gmra.mxu1 %v626_v47 }
 0x121   :  { %v622_v42 = vmul.f32 %v606_v29, %v222_v46 }
 0x123   :  { %v630_v50 = vpack.c.bf16 %v622_v42, %v621_v49 }
 0x128   :  { %738 = vmatmul.bf16.gmra.mxu3 %v630_v50 }
 0x169   :  { %v704_v52 = vpop.f32.mrf.mxu1 }
 0x16a   :  { %744 = vst [vmem:[%s1521_s3] sm:$0xff] %v704_v52 }
 0x171   :  { %v706_v63 = vpop.f32.mrf.mxu1 }
 0x172   :  { %745 = vst [vmem:[%s1521_s3 + $0x8] sm:$0xff] %v706_v63 }
 0x17b   :  { %v724_v14 = vpop.f32.mrf.mxu3 }
 0x17c   :  { %752 = vst [vmem:[%s1521_s3 + $0x40] sm:$0xff] %v724_v14  ;;  %v709_v55 = vpop.f32.mrf.mxu1 }
 0x17d   :  { %746 = vst [vmem:[%s1521_s3 + $0x10] sm:$0xff] %v709_v55 }
 0x183   :  { %v726_v59 = vpop.f32.mrf.mxu3 }
 0x184   :  { %753 = vst [vmem:[%s1521_s3 + $0x48] sm:$0xff] %v726_v59  ;;  %v711_v25 = vpop.f32.mrf.mxu1 }
 0x185   :  { %747 = vst [vmem:[%s1521_s3 + $0x18] sm:$0xff] %v711_v25 }
 0x18b   :  { %v729_v41 = vpop.f32.mrf.mxu3 }
 0x18c   :  { %754 = vst [vmem:[%s1521_s3 + $0x50] sm:$0xff] %v729_v41  ;;  %v714_v35 = vpop.f32.mrf.mxu1 }
 0x18d   :  { %748 = vst [vmem:[%s1521_s3 + $0x20] sm:$0xff] %v714_v35 }
 0x193   :  { %v731_v39 = vpop.f32.mrf.mxu3 }
 0x194   :  { %755 = vst [vmem:[%s1521_s3 + $0x58] sm:$0xff] %v731_v39  ;;  %v716_v17 = vpop.f32.mrf.mxu1 }
 0x195   :  { %749 = vst [vmem:[%s1521_s3 + $0x28] sm:$0xff] %v716_v17 }
 0x19b   :  { %v734_v8 = vpop.f32.mrf.mxu3 }
 0x19c   :  { %756 = vst [vmem:[%s1521_s3 + $0x60] sm:$0xff] %v734_v8  ;;  %v719_v40 = vpop.f32.mrf.mxu1 }
 0x19d   :  { %750 = vst [vmem:[%s1521_s3 + $0x30] sm:$0xff] %v719_v40 }
 0x1a3   :  { %v736_v37 = vpop.f32.mrf.mxu3 }
 0x1a4   :  { %757 = vst [vmem:[%s1521_s3 + $0x68] sm:$0xff] %v736_v37  ;;  %v721_v23 = vpop.f32.mrf.mxu1 }
 0x1a5   :  { %751 = vst [vmem:[%s1521_s3 + $0x38] sm:$0xff] %v721_v23 }
 0x1ab   :  { %v739_v1 = vpop.f32.mrf.mxu3 }
 0x1ac   :  { %758 = vst [vmem:[%s1521_s3 + $0x70] sm:$0xff] %v739_v1 }
 0x1b3   :  { %v741_v57 = vpop.f32.mrf.mxu3 }
 0x1b4   :  { %759 = vst [vmem:[%s1521_s3 + $0x78] sm:$0xff] %v741_v57 }
 0x1b5   :  { %764 = vsyncpa [#allocation3], 1 }

</bundles_post_ra>
